<compile_context>
chip_gen: v5e
topology: v5e:2x2
jax: 0.10.0
libtpu: 0.0.40
codegen_flags: <defaults>
</compile_context>

<pallas_src>
import jax
import jax.numpy as jnp
from jax.experimental import pallas as pl
from jax.experimental.pallas import tpu as pltpu

EMBEDDING_DIM = 32
H1 = 512
H2 = 128
OUT = 1
DEFAULT_TB = 1024  # batch rows per grid step (keeps >=2 steps for pipelining
                   # and megacore split at realistic batch sizes; VMEM per step
                   # stays well under the scoped limit on v5e/v6e/v7x)


def mlp_kernel(x_ref, w1_ref, b1_ref, w2_ref, b2_ref, w3_ref, b3_ref, o_ref):
    # inputs.float()
    x = x_ref[...].astype(jnp.float32)
    # Linear(embedding_dim, 512)  -> MXU
    h1 = jnp.dot(x, w1_ref[...], preferred_element_type=jnp.float32) + b1_ref[...]
    # Linear(512, 128)            -> MXU (N=128 lane-dense)
    h2 = jnp.dot(h1, w2_ref[...], preferred_element_type=jnp.float32) + b2_ref[...]
    # Linear(128, 1): VPU broadcast-multiply by the (1,128) weight row (native
    # PyTorch (out,in) layout, lane-dense) + XLU cross-lane reduce. Avoids a
    # pathologically lane-sparse N=1 MXU matmul.
    o_ref[...] = (h2 * w3_ref[...]).sum(axis=-1, keepdims=True) + b3_ref[...]


def lstm_net_forward(x, params, *, tb=DEFAULT_TB):
    """x: (batch, embedding_dim) any float dtype.
    params: w1 (emb,512), b1 (1,512), w2 (512,128), b2 (1,128),
            w3 (1,128) [PyTorch (out,in) layout], b3 (1,1)."""
    batch, emb = x.shape
    w1, b1, w2, b2, w3, b3 = (
        params["w1"], params["b1"], params["w2"],
        params["b2"], params["w3"], params["b3"],
    )

    # Batch tile: multiple of 8 sublanes, capped at tb; pad batch to a multiple.
    tile = min(tb, max(8, ((batch + 7) // 8) * 8))
    padded = ((batch + tile - 1) // tile) * tile
    if padded != batch:
        x = jnp.pad(x, ((0, padded - batch), (0, 0)))
    num_tiles = padded // tile

    flops = 2 * padded * (emb * H1 + H1 * H2 + H2 * OUT)
    bytes_accessed = 4 * (
        padded * emb + padded * OUT
        + w1.size + b1.size + w2.size + b2.size + w3.size + b3.size
    )

    out = pl.pallas_call(
        mlp_kernel,
        out_shape=jax.ShapeDtypeStruct((padded, OUT), jnp.float32),
        grid_spec=pltpu.PrefetchScalarGridSpec(
            num_scalar_prefetch=0,
            grid=(num_tiles,),
            in_specs=[
                pl.BlockSpec((tile, emb), lambda i: (i, 0)),  # x: streamed / pipelined
                pl.BlockSpec((emb, H1), lambda i: (0, 0)),    # w1: VMEM-resident
                pl.BlockSpec((1, H1),   lambda i: (0, 0)),    # b1
                pl.BlockSpec((H1, H2),  lambda i: (0, 0)),    # w2
                pl.BlockSpec((1, H2),   lambda i: (0, 0)),    # b2
                pl.BlockSpec((1, H2),   lambda i: (0, 0)),    # w3 row (lane-dense)
                pl.BlockSpec((1, OUT),  lambda i: (0, 0)),    # b3
            ],
            out_specs=pl.BlockSpec((tile, OUT), lambda i: (i, 0)),
        ),
        compiler_params=pltpu.CompilerParams(
            dimension_semantics=("parallel",),  # megacore split on v7x
        ),
        cost_estimate=pl.CostEstimate(
            flops=flops, transcendentals=0, bytes_accessed=bytes_accessed),
    )(x, w1, b1, w2, b2, w3, b3)

    return out[:batch]


def init_params(key, embedding_dim=EMBEDDING_DIM):
    """nn.Linear-style init (uniform +/- 1/sqrt(fan_in)).
    w1/w2 stored transposed (in,out) for x @ W; w3 kept in PyTorch (out,in)=(1,128)."""
    keys = jax.random.split(key, 6)

    def uniform(k, shape, fan_in):
        bound = 1.0 / jnp.sqrt(jnp.float32(fan_in))
        return jax.random.uniform(k, shape, jnp.float32, -bound, bound)

    return {
        "w1": uniform(keys[0], (embedding_dim, H1), embedding_dim),
        "b1": uniform(keys[1], (1, H1), embedding_dim),
        "w2": uniform(keys[2], (H1, H2), H1),
        "b2": uniform(keys[3], (1, H2), H1),
        "w3": uniform(keys[4], (1, H2), H2),   # PyTorch layout (out=1, in=128)
        "b3": uniform(keys[5], (1, OUT), H2),
    }


def _reference(x, params):
    h = x.astype(jnp.float32)
    h = h @ params["w1"] + params["b1"]
    h = h @ params["w2"] + params["b2"]
    return h @ params["w3"].T + params["b3"]


if __name__ == "__main__":
    key = jax.random.PRNGKey(0)
    k_param, k_x1, k_x2 = jax.random.split(key, 3)

    params = init_params(k_param)

    # Small primary test (single grid step).
    batch = 8
    x = jax.random.normal(k_x1, (batch, EMBEDDING_DIM), dtype=jnp.float32)
    out = jax.block_until_ready(lstm_net_forward(x, params))
    ref = _reference(x, params)
    assert out.shape == (batch, OUT)
    assert jnp.allclose(out, ref, atol=1e-4, rtol=1e-4)

    # Secondary test: exercises multi-step grid pipelining + batch padding.
    batch2 = 200
    x2 = jax.random.normal(k_x2, (batch2, EMBEDDING_DIM), dtype=jnp.float32)
    out2 = jax.block_until_ready(lstm_net_forward(x2, params, tb=64))
    ref2 = _reference(x2, params)
    assert out2.shape == (batch2, OUT)
    assert jnp.allclose(out2, ref2, atol=1e-4, rtol=1e-4)

    print("KERNEL_OK")
</pallas_src>

<mosaic_0001>
module attributes {stable_mosaic.version = 11 : i64} {
  func.func @mlp_kernel(%arg0: i32, %arg1: memref<8x32xf32, #tpu.memory_space<vmem>>, %arg2: memref<32x512xf32, #tpu.memory_space<vmem>>, %arg3: memref<1x512xf32, #tpu.memory_space<vmem>>, %arg4: memref<512x128xf32, #tpu.memory_space<vmem>>, %arg5: memref<1x128xf32, #tpu.memory_space<vmem>>, %arg6: memref<1x128xf32, #tpu.memory_space<vmem>>, %arg7: memref<1x1xf32, #tpu.memory_space<vmem>>, %arg8: memref<8x1xf32, #tpu.memory_space<vmem>>) attributes {dimension_semantics = [#tpu.dimension_semantics<parallel>], iteration_bounds = array<i64: 1>, scalar_prefetch = 0 : i64, scratch_operands = 0 : i64, tpu.core_type = #tpu.core_type<tc>, window_params = [{transform_indices = @transform_0, window_bounds = array<i64: 8, 32>}, {pipeline_mode = #tpu.pipeline_mode<synchronous>, transform_indices = @transform_1, window_bounds = array<i64: 32, 512>}, {pipeline_mode = #tpu.pipeline_mode<synchronous>, transform_indices = @transform_2, window_bounds = array<i64: 1, 512>}, {pipeline_mode = #tpu.pipeline_mode<synchronous>, transform_indices = @transform_3, window_bounds = array<i64: 512, 128>}, {pipeline_mode = #tpu.pipeline_mode<synchronous>, transform_indices = @transform_4, window_bounds = array<i64: 1, 128>}, {pipeline_mode = #tpu.pipeline_mode<synchronous>, transform_indices = @transform_5, window_bounds = array<i64: 1, 128>}, {pipeline_mode = #tpu.pipeline_mode<synchronous>, transform_indices = @transform_6, window_bounds = array<i64: 1, 1>}, {transform_indices = @transform_7, window_bounds = array<i64: 8, 1>}]} {
    %c0 = arith.constant 0 : index
    %c0_0 = arith.constant 0 : index
    %0 = vector.load %arg1[%c0, %c0_0] : memref<8x32xf32, #tpu.memory_space<vmem>>, vector<8x32xf32>
    %c0_1 = arith.constant 0 : index
    %c0_2 = arith.constant 0 : index
    %1 = vector.load %arg2[%c0_1, %c0_2] : memref<32x512xf32, #tpu.memory_space<vmem>>, vector<32x512xf32>
    %cst = arith.constant dense<0.000000e+00> : vector<8x512xf32>
    %2 = tpu.matmul %0, %1, %cst {dimension_numbers = #tpu.dot_dimension_numbers<[1], [0], [0], [1], [0, 0, 1, 1], [], []>} : vector<8x32xf32>, vector<32x512xf32>, vector<8x512xf32> -> vector<8x512xf32>
    %c0_3 = arith.constant 0 : index
    %c0_4 = arith.constant 0 : index
    %3 = vector.load %arg3[%c0_3, %c0_4] : memref<1x512xf32, #tpu.memory_space<vmem>>, vector<1x512xf32>
    %4 = vector.broadcast %3 : vector<1x512xf32> to vector<8x512xf32>
    %5 = arith.addf %2, %4 : vector<8x512xf32>
    %c0_5 = arith.constant 0 : index
    %c0_6 = arith.constant 0 : index
    %6 = vector.load %arg4[%c0_5, %c0_6] : memref<512x128xf32, #tpu.memory_space<vmem>>, vector<512x128xf32>
    %cst_7 = arith.constant dense<0.000000e+00> : vector<8x128xf32>
    %7 = tpu.matmul %5, %6, %cst_7 {dimension_numbers = #tpu.dot_dimension_numbers<[1], [0], [0], [1], [0, 0, 1, 1], [], []>} : vector<8x512xf32>, vector<512x128xf32>, vector<8x128xf32> -> vector<8x128xf32>
    %c0_8 = arith.constant 0 : index
    %c0_9 = arith.constant 0 : index
    %8 = vector.load %arg5[%c0_8, %c0_9] : memref<1x128xf32, #tpu.memory_space<vmem>>, vector<1x128xf32>
    %9 = vector.broadcast %8 : vector<1x128xf32> to vector<8x128xf32>
    %10 = arith.addf %7, %9 : vector<8x128xf32>
    %c0_10 = arith.constant 0 : index
    %c0_11 = arith.constant 0 : index
    %11 = vector.load %arg6[%c0_10, %c0_11] : memref<1x128xf32, #tpu.memory_space<vmem>>, vector<1x128xf32>
    %12 = vector.broadcast %11 : vector<1x128xf32> to vector<8x128xf32>
    %13 = arith.mulf %10, %12 : vector<8x128xf32>
    %cst_12 = arith.constant dense<0.000000e+00> : vector<8xf32>
    %14 = vector.multi_reduction <add>, %13, %cst_12 [1] : vector<8x128xf32> to vector<8xf32>
    %15 = vector.shape_cast %14 : vector<8xf32> to vector<8x1xf32>
    %c0_13 = arith.constant 0 : index
    %c0_14 = arith.constant 0 : index
    %16 = vector.load %arg7[%c0_13, %c0_14] : memref<1x1xf32, #tpu.memory_space<vmem>>, vector<1x1xf32>
    %17 = vector.broadcast %16 : vector<1x1xf32> to vector<8x1xf32>
    %18 = arith.addf %15, %17 : vector<8x1xf32>
    %c0_15 = arith.constant 0 : index
    %c0_16 = arith.constant 0 : index
    %19 = vector.load %arg8[%c0_15, %c0_16] : memref<8x1xf32, #tpu.memory_space<vmem>>, vector<8x1xf32>
    tpu.vector_store %arg8[%c0_15, %c0_16], %18 {strides = array<i32>} : memref<8x1xf32, #tpu.memory_space<vmem>>, vector<8x1xf32>,
    return
  }
  func.func @transform_0(%arg0: i32) -> (i32, i32) {
    %c0_i32 = arith.constant 0 : i32
    %c0_i32_0 = arith.constant 0 : i32
    return %arg0, %c0_i32 : i32, i32
  }
  func.func @transform_1(%arg0: i32) -> (i32, i32) {
    %c0_i32 = arith.constant 0 : i32
    %c0_i32_0 = arith.constant 0 : i32
    %c0_i32_1 = arith.constant 0 : i32
    return %c0_i32, %c0_i32_0 : i32, i32
  }
  func.func @transform_2(%arg0: i32) -> (i32, i32) {
    %c0_i32 = arith.constant 0 : i32
    %c0_i32_0 = arith.constant 0 : i32
    %c0_i32_1 = arith.constant 0 : i32
    return %c0_i32, %c0_i32_0 : i32, i32
  }
  func.func @transform_3(%arg0: i32) -> (i32, i32) {
    %c0_i32 = arith.constant 0 : i32
    %c0_i32_0 = arith.constant 0 : i32
    %c0_i32_1 = arith.constant 0 : i32
    return %c0_i32, %c0_i32_0 : i32, i32
  }
  func.func @transform_4(%arg0: i32) -> (i32, i32) {
    %c0_i32 = arith.constant 0 : i32
    %c0_i32_0 = arith.constant 0 : i32
    %c0_i32_1 = arith.constant 0 : i32
    return %c0_i32, %c0_i32_0 : i32, i32
  }
  func.func @transform_5(%arg0: i32) -> (i32, i32) {
    %c0_i32 = arith.constant 0 : i32
    %c0_i32_0 = arith.constant 0 : i32
    %c0_i32_1 = arith.constant 0 : i32
    return %c0_i32, %c0_i32_0 : i32, i32
  }
  func.func @transform_6(%arg0: i32) -> (i32, i32) {
    %c0_i32 = arith.constant 0 : i32
    %c0_i32_0 = arith.constant 0 : i32
    %c0_i32_1 = arith.constant 0 : i32
    return %c0_i32, %c0_i32_0 : i32, i32
  }
  func.func @transform_7(%arg0: i32) -> (i32, i32) {
    %c0_i32 = arith.constant 0 : i32
    %c0_i32_0 = arith.constant 0 : i32
    return %arg0, %c0_i32 : i32, i32
  }
}

</mosaic_0001>

<bundles_post_ra>
// kernel: tpu_custom_call.1
= control target key start
LH: loop header
LB: loop body
LE: loop exit
PB: predicated region body
PF: predicated region fallthrough
CT: control target
= control target key end

     0   :  { %s560_s0 = inlined_call_operand.hbm [shape: f32[8,32], index: 0, kind: input, shape index: {}]   ;;  %s561_s1 = inlined_call_operand.hbm [shape: f32[32,512], index: 1, kind: input, shape index: {}]   ;;  %s562_s2 = inlined_call_operand.hbm [shape: f32[1,512], index: 2, kind: input, shape index: {}]   ;;  %s563_s3 = inlined_call_operand.hbm [shape: f32[512,128], index: 3, kind: input, shape index: {}]   ;;  %s564_s4 = inlined_call_operand.vmem [shape: f32[1,128], index: 4, kind: input, shape index: {}]   ;;  %s565_s5 = inlined_call_operand.vmem [shape: f32[1,128], index: 5, kind: input, shape index: {}]   ;;  %s566_s6 = inlined_call_operand.<no memory space> [shape: f32[1,1], index: 6, kind: input, shape index: {}]   ;;  %s567_s7 = inlined_call_operand.vmem [shape: f32[8,1], index: 7, kind: output, shape index: {}]  }
   0x1   :  { %v12_v0 = vstv %s566_s6 }
   0x2   :  { %13 = vst [vmem:[#allocation2] sm:$0x1] %v12_v0 }
   0x3   :  { %14 = vsyncpa [#allocation4], 0 }
   0x4   :  { %15 = vsyncpa [#allocation6], 0  ;;  %s32_s28 = sshll.u32 %s561_s1, 4  ;;  %s33_s28 = int_to_ptr.hbm [resolvable:$true] %s32_s28 }
   0x5   :  { %16 = vsyncpa [#allocation9], 0  ;;  %s484_s29 = smov [#allocation5]   ;;  %s22_s10 = sshll.u32 %s560_s0, 4  ;;  %s23_s10 = int_to_ptr.hbm [resolvable:$true] %s22_s10 }
   0x6   :  { %s34_s30 = sshll.u32 %s484_s29, 4  ;;  %s485_s11 = smov 512   ;;  %s35_s30 = int_to_ptr.vmem [resolvable:$true] %s34_s30 }
   0x7   :  { %s486_s12 = smov 32   ;;  %s487_s6 = smov [#allocation3]  }
   0x8   :  { %40 = dma.hbm_to_vmem [thread:$0]  %s33_s28, 2048, %s35_s30, [#allocation6], %s485_s11, %s485_s11, %s486_s12  }
   0x9   :  { %s24_s13 = sshll.u32 %s487_s6, 4  ;;  %s46_s16 = sshll.u32 %s562_s2, 4  ;;  %s25_s13 = int_to_ptr.vmem [resolvable:$true] %s24_s13  ;;  %s47_s16 = int_to_ptr.hbm [resolvable:$true] %s46_s16 }
   0xa   :  { %27 = dma.hbm_to_vmem [thread:$0]  %s23_s10, 128, %s25_s13, [#allocation4]  }
   0xb   :  { %s56_s18 = sshll.u32 %s563_s3, 4  ;;  %s488_s19 = smov [#allocation7]   ;;  %s57_s18 = int_to_ptr.hbm [resolvable:$true] %s56_s18 }
   0xc   :  { %s48_s20 = sshll.u32 %s488_s19, 4  ;;  %s489_s0 = smov [#allocation8]   ;;  %s49_s20 = int_to_ptr.vmem [resolvable:$true] %s48_s20 }
   0xd   :  { %51 = dma.hbm_to_vmem [thread:$0]  %s47_s16, 64, %s49_s20, [#allocation6]  }
   0xe   :  { %s58_s21 = sshll.u32 %s489_s0, 4  ;;  %s490_s22 = smov 128   ;;  %s59_s21 = int_to_ptr.vmem [resolvable:$true] %s58_s21 }
   0xf   :  { %s491_s23 = smov 8  }
  0x10   :  { %64 = dma.hbm_to_vmem [thread:$0]  %s57_s18, 8192, %s59_s21, [#allocation9], %s490_s22, %s490_s22, %s491_s23  }
  0x11   :  { %478 = dma.done.wait [#allocation4], 128  }
  0x12   :  { %479 = vsyncadd [#allocation4], 4294967168 }
  0x13   :  { %480 = dma.done.wait [#allocation6], 2112  }
  0x14   :  { %481 = vsyncadd [#allocation6], 4294965184 }
  0x15   :  { %482 = dma.done.wait [#allocation9], 8192  }
  0x16   :  { %483 = vsyncadd [#allocation9], 4294959104  ;;  %v102_v1 = vld [vmem:[#allocation5 + $0x70] sm:$0xff]  ;;  %v103_v3 = vld [vmem:[#allocation5 + $0x78] sm:$0xff]  ;;  %vm114_vm0 = vcmask 261120   ;;  %vm358_vm1 = vcmask 7168  }
  0x17   :  { %v98_v2 = vld [vmem:[#allocation5 + $0x50] sm:$0xff]  ;;  %170 = vmatpush.msra.mxu2 %v102_v1  ;;  %190 = vmatpush.msra.mxu3 %v103_v3  ;;  %v99_v4 = vld [vmem:[#allocation5 + $0x58] sm:$0xff]  ;;  %v100_v7 = vld [vmem:[#allocation5 + $0x60] sm:$0xff] }
  0x18   :  { %v94_v5 = vld [vmem:[#allocation5 + $0x30] sm:$0xff]  ;;  %v95_v6 = vld [vmem:[#allocation5 + $0x38] sm:$0xff]  ;;  %v96_v8 = vld [vmem:[#allocation5 + $0x40] sm:$0xff]  ;;  %130 = vmatpush.msra.mxu0 %v100_v7 }
  0x19   :  { %171 = vmatpush.msra.mxu2 %v98_v2  ;;  %191 = vmatpush.msra.mxu3 %v99_v4  ;;  %v101_v9 = vld [vmem:[#allocation5 + $0x68] sm:$0xff]  ;;  %v90_v10 = vld [vmem:[#allocation5 + $0x10] sm:$0xff]  ;;  %v91_v11 = vld [vmem:[#allocation5 + $0x18] sm:$0xff] }
  0x1a   :  { %150 = vmatpush.msra.mxu1 %v101_v9  ;;  %v97_v12 = vld [vmem:[#allocation5 + $0x48] sm:$0xff]  ;;  %v87_v13 = vld [vmem:[#allocation3] sm:$0xff]  ;;  %131 = vmatpush.msra.mxu0 %v96_v8  ;;  %v92_v14 = vld [vmem:[#allocation5 + $0x20] sm:$0xff] }
  0x1b   :  { %172 = vmatpush.msra.mxu2 %v94_v5  ;;  %192 = vmatpush.msra.mxu3 %v95_v6  ;;  %v93_v15 = vld [vmem:[#allocation5 + $0x28] sm:$0xff]  ;;  %v245_v16 = vld [vmem:[#allocation8 + $0x178] sm:$0xff]  ;;  %v244_v21 = vld [vmem:[#allocation8 + $0x170] sm:$0xff] }
  0x1c   :  { %151 = vmatpush.msra.mxu1 %v97_v12  ;;  %v261_v17 = vld [vmem:[#allocation8 + $0x1f8] sm:$0xff]  ;;  %v89_v19 = vld [vmem:[#allocation5 + $0x8] sm:$0xff]  ;;  %132 = vmatpush.msra.mxu0 %v92_v14  ;;  %v260_v23 = vld [vmem:[#allocation8 + $0x1f0] sm:$0xff] }
  0x1d   :  { %173 = vmatpush.msra.mxu2 %v90_v10  ;;  %193 = vmatpush.msra.mxu3 %v91_v11  ;;  %v88_v18 = vld [vmem:[#allocation5] sm:$0xff]  ;;  %v212_v24 = vld [vmem:[#allocation8 + $0x70] sm:$0xff]  ;;  %v243_v25 = vld [vmem:[#allocation8 + $0x168] sm:$0xff] }
  0x1e   :  { %369 = vmatmul.msk.f32.vlgmr.msra.gmra.mxu2 %vm114_vm0, %v87_v13  ;;  %370 = vmatmul.msk.f32.vlgmr.msra.gmra.mxu3 %vm114_vm0, %v87_v13  ;;  %v213_v20 = vld [vmem:[#allocation8 + $0x78] sm:$0xff]  ;;  %v228_v26 = vld [vmem:[#allocation8 + $0xf0] sm:$0xff]  ;;  %v259_v27 = vld [vmem:[#allocation8 + $0x1e8] sm:$0xff] }
  0x1f   :  { %152 = vmatpush.msra.mxu1 %v93_v15  ;;  %306 = vmatpush.msrb.mxu2 %v245_v16  ;;  %v229_v22 = vld [vmem:[#allocation8 + $0xf8] sm:$0xff]  ;;  %v211_v28 = vld [vmem:[#allocation8 + $0x68] sm:$0xff]  ;;  %v242_v29 = vld [vmem:[#allocation8 + $0x160] sm:$0xff] }
  0x20   :  { %326 = vmatpush.msrb.mxu3 %v261_v17  ;;  %133 = vmatpush.msra.mxu0 %v88_v18  ;;  %v227_v30 = vld [vmem:[#allocation8 + $0xe8] sm:$0xff]  ;;  %v258_v31 = vld [vmem:[#allocation8 + $0x1e0] sm:$0xff]  ;;  %v241_v33 = vld [vmem:[#allocation8 + $0x158] sm:$0xff] }
  0x21   :  { %153 = vmatpush.msra.mxu1 %v89_v19  ;;  %367 = vmatmul.msk.f32.vlgmr.msra.gmra.mxu0 %vm114_vm0, %v87_v13  ;;  %v210_v32 = vld [vmem:[#allocation8 + $0x60] sm:$0xff]  ;;  %v257_v35 = vld [vmem:[#allocation8 + $0x1d8] sm:$0xff]  ;;  %v240_v37 = vld [vmem:[#allocation8 + $0x150] sm:$0xff] }
  0x22   :  { %368 = vmatmul.msk.f32.vlgmr.msra.gmra.mxu1 %vm114_vm0, %v87_v13  ;;  %266 = vmatpush.msrb.mxu0 %v213_v20  ;;  %v226_v34 = vld [vmem:[#allocation8 + $0xe0] sm:$0xff]  ;;  %v209_v36 = vld [vmem:[#allocation8 + $0x58] sm:$0xff]  ;;  %v256_v39 = vld [vmem:[#allocation8 + $0x1d0] sm:$0xff] }
  0x23   :  { %307 = vmatpush.msrb.mxu2 %v244_v21  ;;  %286 = vmatpush.msrb.mxu1 %v229_v22  ;;  %v225_v38 = vld [vmem:[#allocation8 + $0xd8] sm:$0xff]  ;;  %v208_v40 = vld [vmem:[#allocation8 + $0x50] sm:$0xff]  ;;  %v239_v41 = vld [vmem:[#allocation8 + $0x148] sm:$0xff] }
  0x24   :  { %327 = vmatpush.msrb.mxu3 %v260_v23  ;;  %267 = vmatpush.msrb.mxu0 %v212_v24  ;;  %v224_v42 = vld [vmem:[#allocation8 + $0xd0] sm:$0xff]  ;;  %v255_v43 = vld [vmem:[#allocation8 + $0x1c8] sm:$0xff]  ;;  %v238_v45 = vld [vmem:[#allocation8 + $0x140] sm:$0xff] }
  0x25   :  { %308 = vmatpush.msrb.mxu2 %v243_v25  ;;  %287 = vmatpush.msrb.mxu1 %v228_v26  ;;  %v207_v44 = vld [vmem:[#allocation8 + $0x48] sm:$0xff]  ;;  %v254_v47 = vld [vmem:[#allocation8 + $0x1c0] sm:$0xff]  ;;  %v237_v49 = vld [vmem:[#allocation8 + $0x138] sm:$0xff] }
  0x26   :  { %328 = vmatpush.msrb.mxu3 %v259_v27  ;;  %268 = vmatpush.msrb.mxu0 %v211_v28  ;;  %v223_v46 = vld [vmem:[#allocation8 + $0xc8] sm:$0xff]  ;;  %v206_v48 = vld [vmem:[#allocation8 + $0x40] sm:$0xff]  ;;  %v253_v51 = vld [vmem:[#allocation8 + $0x1b8] sm:$0xff] }
  0x27   :  { %309 = vmatpush.msrb.mxu2 %v242_v29  ;;  %288 = vmatpush.msrb.mxu1 %v227_v30  ;;  %v222_v50 = vld [vmem:[#allocation8 + $0xc0] sm:$0xff]  ;;  %v205_v52 = vld [vmem:[#allocation8 + $0x38] sm:$0xff]  ;;  %v236_v53 = vld [vmem:[#allocation8 + $0x130] sm:$0xff] }
  0x28   :  { %329 = vmatpush.msrb.mxu3 %v258_v31  ;;  %269 = vmatpush.msrb.mxu0 %v210_v32  ;;  %v221_v54 = vld [vmem:[#allocation8 + $0xb8] sm:$0xff]  ;;  %v252_v55 = vld [vmem:[#allocation8 + $0x1b0] sm:$0xff]  ;;  %v235_v57 = vld [vmem:[#allocation8 + $0x128] sm:$0xff] }
  0x29   :  { %310 = vmatpush.msrb.mxu2 %v241_v33  ;;  %289 = vmatpush.msrb.mxu1 %v226_v34  ;;  %v204_v56 = vld [vmem:[#allocation8 + $0x30] sm:$0xff]  ;;  %v251_v59 = vld [vmem:[#allocation8 + $0x1a8] sm:$0xff]  ;;  %v234_v61 = vld [vmem:[#allocation8 + $0x120] sm:$0xff] }
  0x2a   :  { %330 = vmatpush.msrb.mxu3 %v257_v35  ;;  %270 = vmatpush.msrb.mxu0 %v209_v36  ;;  %v220_v58 = vld [vmem:[#allocation8 + $0xb0] sm:$0xff]  ;;  %v203_v60 = vld [vmem:[#allocation8 + $0x28] sm:$0xff]  ;;  %v250_v63 = vld [vmem:[#allocation8 + $0x1a0] sm:$0xff] }
  0x2b   :  { %311 = vmatpush.msrb.mxu2 %v240_v37  ;;  %290 = vmatpush.msrb.mxu1 %v225_v38  ;;  %v219_v62 = vld [vmem:[#allocation8 + $0xa8] sm:$0xff]  ;;  %v202_v0 = vld [vmem:[#allocation8 + $0x20] sm:$0xff]  ;;  %v233_v1 = vld [vmem:[#allocation8 + $0x118] sm:$0xff] }
  0x2c   :  { %331 = vmatpush.msrb.mxu3 %v256_v39  ;;  %271 = vmatpush.msrb.mxu0 %v208_v40  ;;  %v218_v2 = vld [vmem:[#allocation8 + $0xa0] sm:$0xff]  ;;  %v249_v3 = vld [vmem:[#allocation8 + $0x198] sm:$0xff]  ;;  %v232_v5 = vld [vmem:[#allocation8 + $0x110] sm:$0xff] }
  0x2d   :  { %312 = vmatpush.msrb.mxu2 %v239_v41  ;;  %291 = vmatpush.msrb.mxu1 %v224_v42  ;;  %v201_v4 = vld [vmem:[#allocation8 + $0x18] sm:$0xff]  ;;  %v200_v6 = vld [vmem:[#allocation8 + $0x10] sm:$0xff]  ;;  %v231_v8 = vld [vmem:[#allocation8 + $0x108] sm:$0xff] }
  0x2e   :  { %332 = vmatpush.msrb.mxu3 %v255_v43  ;;  %272 = vmatpush.msrb.mxu0 %v207_v44  ;;  %v217_v7 = vld [vmem:[#allocation8 + $0x98] sm:$0xff]  ;;  %v248_v9 = vld [vmem:[#allocation8 + $0x190] sm:$0xff]  ;;  %v199_v10 = vld [vmem:[#allocation8 + $0x8] sm:$0xff] }
  0x2f   :  { %313 = vmatpush.msrb.mxu2 %v238_v45  ;;  %292 = vmatpush.msrb.mxu1 %v223_v46  ;;  %v216_v11 = vld [vmem:[#allocation8 + $0x90] sm:$0xff]  ;;  %v230_v12 = vld [vmem:[#allocation8 + $0x100] sm:$0xff]  ;;  %v247_v13 = vld [vmem:[#allocation8 + $0x188] sm:$0xff] }
  0x30   :  { %333 = vmatpush.msrb.mxu3 %v254_v47  ;;  %273 = vmatpush.msrb.mxu0 %v206_v48  ;;  %v198_v14 = vld [vmem:[#allocation8] sm:$0xff]  ;;  %v215_v15 = vld [vmem:[#allocation8 + $0x88] sm:$0xff]  ;;  %v104_v18 = vld [vmem:[#allocation7] sm:$0xf] }
  0x31   :  { %314 = vmatpush.msrb.mxu2 %v237_v49  ;;  %293 = vmatpush.msrb.mxu1 %v222_v50  ;;  %v246_v16 = vld [vmem:[#allocation8 + $0x180] sm:$0xff]  ;;  %v106_v19 = vperm.slane %v104_v18, 0  ;;  %v107_v20 = vperm.slane %v104_v18, 1  ;;  %v108_v21 = vperm.slane %v104_v18, 2  ;;  %v109_v22 = vperm.slane %v104_v18, 3 }
  0x32   :  { %334 = vmatpush.msrb.mxu3 %v253_v51  ;;  %274 = vmatpush.msrb.mxu0 %v205_v52  ;;  %v214_v17 = vld [vmem:[#allocation8 + $0x80] sm:$0xff]  ;;  %v379_v31 = vld [vmem:[%s564_s4] ss:$0 sm:$0xff] }
  0x33   :  { %315 = vmatpush.msrb.mxu2 %v236_v53  ;;  %294 = vmatpush.msrb.mxu1 %v221_v54  ;;  %v380_v39 = vld [vmem:[%s565_s5] ss:$0 sm:$0xff] }
  0x34   :  { %335 = vmatpush.msrb.mxu3 %v252_v55  ;;  %275 = vmatpush.msrb.mxu0 %v204_v56  ;;  %v381_v42 = vld [vmem:[#allocation2] ss:$0 sm:$0xff] }
  0x35   :  { %316 = vmatpush.msrb.mxu2 %v235_v57  ;;  %295 = vmatpush.msrb.mxu1 %v220_v58 }
  0x36   :  { %336 = vmatpush.msrb.mxu3 %v251_v59  ;;  %276 = vmatpush.msrb.mxu0 %v203_v60 }
  0x37   :  { %317 = vmatpush.msrb.mxu2 %v234_v61  ;;  %296 = vmatpush.msrb.mxu1 %v219_v62 }
  0x38   :  { %337 = vmatpush.msrb.mxu3 %v250_v63  ;;  %277 = vmatpush.msrb.mxu0 %v202_v0 }
  0x39   :  { %318 = vmatpush.msrb.mxu2 %v233_v1  ;;  %297 = vmatpush.msrb.mxu1 %v218_v2 }
  0x3a   :  { %338 = vmatpush.msrb.mxu3 %v249_v3  ;;  %278 = vmatpush.msrb.mxu0 %v201_v4 }
  0x3b   :  { %319 = vmatpush.msrb.mxu2 %v232_v5  ;;  %298 = vmatpush.msrb.mxu1 %v217_v7 }
  0x3c   :  { %279 = vmatpush.msrb.mxu0 %v200_v6  ;;  %339 = vmatpush.msrb.mxu3 %v248_v9 }
  0x3d   :  { %320 = vmatpush.msrb.mxu2 %v231_v8  ;;  %299 = vmatpush.msrb.mxu1 %v216_v11 }
  0x3e   :  { %280 = vmatpush.msrb.mxu0 %v199_v10  ;;  %340 = vmatpush.msrb.mxu3 %v247_v13 }
  0x3f   :  { %321 = vmatpush.msrb.mxu2 %v230_v12  ;;  %300 = vmatpush.msrb.mxu1 %v215_v15 }
  0x40   :  { %281 = vmatpush.msrb.mxu0 %v198_v14  ;;  %341 = vmatpush.msrb.mxu3 %v246_v16 }
  0x41   :  { %301 = vmatpush.msrb.mxu1 %v214_v17 }
  0x9e   :  { %v135_v23 = vpop.f32.mrf.mxu0 }
  0x9f   :  { %v155_v24 = vpop.f32.mrf.mxu1  ;;  %v136_v25 = vadd.f32 %v135_v23, %v106_v19 }
  0xa0   :  { %v156_v26 = vadd.f32 %v155_v24, %v107_v20 }
  0xa1   :  { %v175_v27 = vpop.f32.mrf.mxu2  ;;  %v195_v28 = vpop.f32.mrf.mxu3  ;;  %282 = vmatmul.f32.vlgmr.msrb.gmra.mxu0 %v136_v25 }
  0xa2   :  { %v176_v29 = vadd.f32 %v175_v27, %v108_v21  ;;  %v196_v30 = vadd.f32 %v195_v28, %v109_v22  ;;  %302 = vmatmul.f32.vlgmr.msrb.gmra.mxu1 %v156_v26 }
  0xa4   :  { %322 = vmatmul.f32.vlgmr.msrb.gmra.mxu2 %v176_v29  ;;  %342 = vmatmul.f32.vlgmr.msrb.gmra.mxu3 %v196_v30 }
 0x11e   :  { %v283_v32 = vpop.f32.mrf.mxu0 }
 0x11f   :  { %v284_v33 = vadd.f32 %v379_v31, %v283_v32  ;;  %v303_v34 = vpop.f32.mrf.mxu1 }
 0x121   :  { %v304_v35 = vadd.f32 %v303_v34, %v284_v33 }
 0x127   :  { %v323_v36 = vpop.f32.mrf.mxu2  ;;  %v343_v37 = vpop.f32.mrf.mxu3 }
 0x128   :  { %v324_v38 = vadd.f32 %v323_v36, %v304_v35 }
 0x12a   :  { %v344_v40 = vadd.f32 %v343_v37, %v324_v38 }
 0x12c   :  { %v350_v41 = vmul.f32 %v380_v39, %v344_v40 }
 0x12e   :  { %351 = vadd.xlane.f32.xlu0 %v350_v41 }
 0x1a1   :  { %v352_v43 = vpop.xlane.xlu0 %351 }
 0x1a2   :  { %v357_v44 = vadd.f32 %v381_v42, %v352_v43 }
 0x1a4   :  { %359 = vst.msk [vmem:[%s567_s7] sm:$0xff] %vm358_vm1, %v357_v44 }
 0x1a5   :  { %364 = vsyncpa [#allocation4], 1 }
 0x1a6   :  { %365 = vsyncpa [#allocation6], 1 }
 0x1a7   :  { %366 = vsyncpa [#allocation9], 1 }

</bundles_post_ra>
